<compile_context>
chip_gen: v7x
topology: tpu7x:2x2x1
jax: 0.10.0
libtpu: 0.0.40
codegen_flags: <defaults>
</compile_context>

<pallas_src>
from typing import Tuple

import jax
import jax.numpy as jnp
from jax.experimental import pallas as pl
from jax.experimental.pallas import tpu as pltpu


def _copy_kernel(x_ref, o_ref):
    # Pure ref-to-ref assignment: DMA-bound, no VPU / extra store-slot work.
    o_ref[...] = x_ref[...]


# Lane-dense flattening parameters.
_LANE_CANDIDATES = (4096, 2048, 1024, 512, 256, 128)
_TARGET_BLOCK_BYTES = 8 * 1024 * 1024   # per-buffer block; x4 (double-buffered
                                        # in+out) stays <= ~32 MiB on v7x.
_VMEM_LIMIT_CAP = 48 << 20              # < v7x 64 MiB physical; plenty on v5e/v6e.


def _sublane_multiple(dtype) -> int:
    """Sublane packing multiple: 8 for 32-bit, 16 for 16-bit, 32 for 8-bit."""
    itemsize = jnp.dtype(dtype).itemsize
    if itemsize >= 4:
        return 8
    if itemsize == 2:
        return 16
    return 32


def _pick_lane(n: int, sub: int):
    """Largest lane width dividing n, preferring factorizations with dense sublanes."""
    for lane in _LANE_CANDIDATES:          # prefer rows >= packed sublane multiple
        if n % lane == 0 and n // lane >= sub:
            return lane
    for lane in _LANE_CANDIDATES:          # then rows >= 8
        if n % lane == 0 and n // lane >= 8:
            return lane
    for lane in _LANE_CANDIDATES:          # then any multiple of 128
        if n % lane == 0:
            return lane
    return None


def _tiled_copy_2d(x2d: jax.Array, sub: int) -> jax.Array:
    """Pallas identity copy of a lane-dense (rows, lane) slab with ~8 MiB blocks."""
    rows, lane = x2d.shape
    itemsize = jnp.dtype(x2d.dtype).itemsize

    # Byte-based, dtype-aware block target, rounded to the sublane multiple.
    target_rows = max(sub, (_TARGET_BLOCK_BYTES // (lane * itemsize)) // sub * sub)
    row_tile = min(target_rows, rows)

    if row_tile == rows and rows > sub:
        # A single block would cover the array: split into (at least) 2 blocks
        # so the "parallel" grid axis can shard across v7x's two TensorCores.
        half = -(-rows // 2)
        cand = -(-half // sub) * sub
        if cand < rows:
            row_tile = cand
    # else: row_tile < rows (multiple of sub) or full-extent block (exempt
    # from the (8,128) divisibility rule). Partial last blocks are masked.

    grid = (pl.cdiv(rows, row_tile),)
    block_bytes = row_tile * lane * itemsize
    vmem_limit = min(_VMEM_LIMIT_CAP, max(32 << 20, 4 * block_bytes + (4 << 20)))

    return pl.pallas_call(
        _copy_kernel,
        out_shape=jax.ShapeDtypeStruct((rows, lane), x2d.dtype),
        grid=grid,
        in_specs=[pl.BlockSpec((row_tile, lane), lambda i: (i, 0))],
        out_specs=pl.BlockSpec((row_tile, lane), lambda i: (i, 0)),
        compiler_params=pltpu.CompilerParams(
            dimension_semantics=("parallel",),
            vmem_limit_bytes=vmem_limit,
        ),
        cost_estimate=pl.CostEstimate(
            flops=0, transcendentals=0, bytes_accessed=2 * x2d.size * itemsize
        ),
    )(x2d)


def _identity_copy(x: jax.Array) -> jax.Array:
    """Materialized identity via a lane-dense, fixed-tile Pallas copy."""
    n = x.size
    if n == 0:
        return x

    sub = _sublane_multiple(x.dtype)
    lane = _pick_lane(n, sub)

    if lane is not None:
        rows = n // lane
        out = _tiled_copy_2d(x.reshape(rows, lane), sub)
        return out.reshape(x.shape)

    # Element count not a multiple of 128: pad wrapper-side to a dense
    # (sub, 128) multiple, run the same tiled copy, slice back. This avoids
    # the old single-full-array-block fallback that could exceed VMEM on v7x.
    lane = 128
    pad_unit = sub * lane
    flat = x.reshape(-1)
    n_pad = (-n) % pad_unit
    flat_p = jnp.pad(flat, (0, n_pad))
    rows = flat_p.size // lane
    out = _tiled_copy_2d(flat_p.reshape(rows, lane), sub)
    return out.reshape(-1)[:n].reshape(x.shape)


def assert_shape_forward(
    x: jax.Array,
    shape_without_batch: Tuple[int, ...],
    *,
    materialize: bool = False,
) -> jax.Array:
    """Pallas/JAX equivalent of AssertShape.forward.

    Asserts x.shape[1:] == shape_without_batch (static, trace-time check) and
    returns x. By default this is a zero-cost pass-through (no kernel); set
    materialize=True to route through the Pallas identity-copy kernel.
    """
    assert tuple(x.shape[1:]) == tuple(shape_without_batch), (
        f"Wanted shape {tuple(shape_without_batch)}, got {tuple(x.shape[1:])}."
    )
    if not materialize:
        return x  # fastest correct implementation: identity is free
    return _identity_copy(x)


if __name__ == "__main__":
    key = jax.random.PRNGKey(0)
    # Small NCHW input: batch=2, channels=4, spatial=16x16.
    x = jax.random.normal(key, (2, 4, 16, 16), dtype=jnp.float32)
    shape_without_batch = (4, 16, 16)

    # Default fast path: static assert + pass-through (no kernel launched).
    y_fast = assert_shape_forward(x, shape_without_batch)
    assert y_fast is x

    # Materialized path: exercises the Pallas identity-copy kernel once.
    y = assert_shape_forward(x, shape_without_batch, materialize=True)
    y = jax.block_until_ready(y)
    assert y.shape == x.shape and y.dtype == x.dtype
    assert bool(jnp.array_equal(y, x))

    # Awkward element count (not a multiple of 128): exercises the padded
    # fallback path that replaced the single-full-array-block copy.
    x_odd = jax.random.normal(jax.random.PRNGKey(1), (2, 3, 5, 7), dtype=jnp.float32)
    y_odd = assert_shape_forward(x_odd, (3, 5, 7), materialize=True)
    y_odd = jax.block_until_ready(y_odd)
    assert y_odd.shape == x_odd.shape and y_odd.dtype == x_odd.dtype
    assert bool(jnp.array_equal(y_odd, x_odd))

    print("KERNEL_OK")
</pallas_src>

<mosaic_0001>
module attributes {stable_mosaic.version = 11 : i64} {
  func.func @_copy_kernel(%arg0: i32, %arg1: memref<8x256xf32, #tpu.memory_space<vmem>>, %arg2: memref<8x256xf32, #tpu.memory_space<vmem>>) attributes {dimension_semantics = [#tpu.dimension_semantics<parallel>], iteration_bounds = array<i64: 1>, scalar_prefetch = 0 : i64, scratch_operands = 0 : i64, tpu.core_type = #tpu.core_type<tc>, window_params = [{transform_indices = @transform_0, window_bounds = array<i64: 8, 256>}, {transform_indices = @transform_1, window_bounds = array<i64: 8, 256>}]} {
    %c0 = arith.constant 0 : index
    %c0_0 = arith.constant 0 : index
    %0 = vector.load %arg1[%c0, %c0_0] : memref<8x256xf32, #tpu.memory_space<vmem>>, vector<8x256xf32>
    %c0_1 = arith.constant 0 : index
    %c0_2 = arith.constant 0 : index
    %1 = vector.load %arg2[%c0_1, %c0_2] : memref<8x256xf32, #tpu.memory_space<vmem>>, vector<8x256xf32>
    tpu.vector_store %arg2[%c0_1, %c0_2], %0 {strides = array<i32>} : memref<8x256xf32, #tpu.memory_space<vmem>>, vector<8x256xf32>,
    return
  }
  func.func @transform_0(%arg0: i32) -> (i32, i32) {
    %c0_i32 = arith.constant 0 : i32
    %c0_i32_0 = arith.constant 0 : i32
    return %arg0, %c0_i32 : i32, i32
  }
  func.func @transform_1(%arg0: i32) -> (i32, i32) {
    %c0_i32 = arith.constant 0 : i32
    %c0_i32_0 = arith.constant 0 : i32
    return %arg0, %c0_i32 : i32, i32
  }
}

</mosaic_0001>

<bundles_post_ra>
// kernel: tpu_custom_call.1
= control target key start
LH: loop header
LB: loop body
LE: loop exit
PB: predicated region body
PF: predicated region fallthrough
CT: control target
= control target key end

     0   :  { %6 = vsyncpa [#allocation3], 0  ;;  %s126_s0 = inlined_call_operand.hbm [shape: f32[8,256], index: 0, kind: input, shape index: {}]   ;;  %s127_s1 = inlined_call_operand.hbm [shape: f32[8,256], index: 1, kind: output, shape index: {}]  }
   0x1   :  { %7 = vsyncpa [#allocation4], 0  ;;  %s90_s6 = smov [#allocation2]   ;;  %s42_s10 = scalar_lea.hbm %s126_s0, 256 }
   0x2   :  { %s14_s7 = sshll.u32 %s90_s6, 4  ;;  %p43_p0 = scmp.ne.s32.totalorder %s126_s0, %s42_s10  ;;  %s15_s7 = int_to_ptr.vmem [resolvable:$true] %s14_s7 }
   0x3   :  { %p46_p1 = scmp.lt.u32.totalorder %s42_s10, %s126_s0 }
   0x5   :  { %p48_p2 = pnand %p46_p1, %p43_p0 }
   0x7   :  { %51 = shalt.err (!%p48_p2)
}
   0x8   :  { %s52_s15 = scalar_lea.vmem %s15_s7, 256  ;;  %p57_p4 = scmp.lt.s32.totalorder %s15_s7, %s15_s7 }
   0x9   :  { %p53_p3 = scmp.ne.s32.totalorder %s15_s7, %s52_s15  ;;  %p58_p5 = scmp.lt.s32.totalorder %s52_s15, %s52_s15 }
   0xb   :  { %p59_p6 = por %p58_p5, %p57_p4 }
   0xd   :  { %p60_p7 = pnand %p59_p6, %p53_p3 }
   0xf   :  { %63 = shalt.err (!%p60_p7)
}
  0x10   :  { %17 = dma.hbm_to_vmem [thread:$0]  %s126_s0, 256, %s15_s7, [#allocation3]  }
  0x11   :  { %86 = dma.done.wait [#allocation3], 256  }
  0x12   :  { %87 = vsyncadd [#allocation3], 4294967040  ;;  %s91_s18 = smov [#allocation5]   ;;  %v21_v0 = vld [vmem:[#allocation2] sm:$0xff]  ;;  %v22_v1 = vld [vmem:[#allocation2 + $0x8] sm:$0xff] }
  0x13   :  { %s31_s19 = sshll.u32 %s91_s18, 4  ;;  %23 = vst [vmem:[#allocation5] sm:$0xff] %v21_v0  ;;  %24 = vst [vmem:[#allocation5 + $0x8] sm:$0xff] %v22_v1  ;;  %s32_s19 = int_to_ptr.vmem [resolvable:$true] %s31_s19 }
  0x14   :  { %s64_s20 = scalar_lea.vmem %s32_s19, 256  ;;  %p69_p9 = scmp.lt.s32.totalorder %s32_s19, %s32_s19 }
  0x15   :  { %p65_p8 = scmp.ne.s32.totalorder %s32_s19, %s64_s20  ;;  %p70_p10 = scmp.lt.s32.totalorder %s64_s20, %s64_s20 }
  0x17   :  { %p71_p11 = por %p70_p10, %p69_p9 }
  0x19   :  { %p72_p12 = pnand %p71_p11, %p65_p8 }
  0x1b   :  { %75 = shalt.err (!%p72_p12)
}
  0x1c   :  { %s76_s0 = scalar_lea.hbm %s127_s1, 256 }
  0x1d   :  { %p77_p13 = scmp.ne.s32.totalorder %s127_s1, %s76_s0  ;;  %p80_p0 = scmp.lt.u32.totalorder %s76_s0, %s127_s1 }
  0x1f   :  { %p82_p1 = pnand %p80_p0, %p77_p13 }
  0x21   :  { %85 = shalt.err (!%p82_p1)
}
  0x22   :  { %34 = dma.vmem_to_hbm [thread:$0]  %s32_s19, 256, %s127_s1, [#allocation4]  }
  0x23   :  { %88 = dma.done.wait [#allocation4], 256  }
  0x24   :  { %89 = vsyncadd [#allocation4], 4294967040 }
  0x25   :  { %38 = vsyncpa [#allocation3], 1 }
  0x26   :  { %39 = vsyncpa [#allocation4], 1 }

</bundles_post_ra>
